<compile_context>
chip_gen: v6e
topology: v6e:2x2x1
jax: 0.10.0
libtpu: 0.0.40
codegen_flags: <defaults>
</compile_context>

<pallas_src>
import math
from functools import partial

import jax
import jax.numpy as jnp
from jax.experimental import pallas as pl
from jax.experimental.pallas import tpu as pltpu


# ----------------------------- pe table (init-time, matches torch) ----------

def _build_pe(d_model: int, max_len: int = 5000) -> jnp.ndarray:
    """Replicates PositionalEncoding.__init__ buffer: (max_len, 1, d_model), f32."""
    assert d_model % 2 == 0, "reference module assumes even d_model"
    position = jnp.arange(0, max_len, dtype=jnp.float32)[:, None]            # (max_len, 1)
    div_term = jnp.exp(
        jnp.arange(0, d_model, 2, dtype=jnp.float32) * (-math.log(10000.0) / d_model)
    )                                                                         # (d_model/2,)
    args = position * div_term                                                # (max_len, d/2)
    pe = jnp.zeros((max_len, d_model), dtype=jnp.float32)
    pe = pe.at[:, 0::2].set(jnp.sin(args))
    pe = pe.at[:, 1::2].set(jnp.cos(args))
    return pe[:, None, :]                                                     # (max_len, 1, d_model)


# ----------------------------- kernels ---------------------------------------

def _pos_enc_kernel_2d(x_ref, pe_ref, o_ref, *, batch: int):
    # x_ref / o_ref: (seq_blk, batch*d_model); pe_ref: (seq_blk, d_model)
    pe = pe_ref[...]
    if batch > 1:
        # Lane-axis replicate: out[s, b*d + j] needs pe[s, j]; a concatenation of
        # `batch` identical pieces along the minor axis gives exactly that layout.
        pe = jnp.concatenate([pe] * batch, axis=-1)
    o_ref[...] = (x_ref[...] + pe).astype(o_ref.dtype)


def _pos_enc_kernel_3d(x_ref, pe_ref, o_ref):
    # x_ref / o_ref: (seq_blk, batch, d_model); pe_ref: (seq_blk, 1, d_model)
    o_ref[...] = (x_ref[...] + pe_ref[...]).astype(o_ref.dtype)


# ----------------------------- padded-VMEM planning --------------------------

def _round_up(n: int, m: int) -> int:
    return -(-n // m) * m


def _sublanes(dtype) -> int:
    # f32 -> 8, bf16 -> 16, int8/fp8 -> 32 rows per packed sublane group.
    return max(1, 32 // jnp.dtype(dtype).itemsize)


def _plan_2d(seq_len, batch, d_model, x_dtype, pe_dtype, out_dtype,
             vmem_budget=24 << 20, seq_block=None):
    isx, ispe, iso = (jnp.dtype(d).itemsize for d in (x_dtype, pe_dtype, out_dtype))
    lane_x = _round_up(batch * d_model, 128)
    lane_pe = _round_up(d_model, 128)
    # Padded bytes per seq row: double-buffered x/out/pe blocks plus one
    # single-buffered in-kernel broadcast-pe temporary (promoted dtype).
    per_row = 2 * (lane_x * isx + lane_x * iso + lane_pe * ispe) + lane_x * iso
    if seq_block is None:
        blk = max(8, vmem_budget // per_row)
        blk = min(blk, 2048)
        blk = min(blk, _round_up(-(-seq_len // 2), 8))   # >= 2 grid steps (v7x megacore)
    else:
        blk = int(seq_block)
    if blk >= seq_len or seq_len <= 8:
        blk = seq_len                                    # full block: always layout-legal
    else:
        blk = max(8, (blk // 8) * 8)                     # sublane-legal tile
    pad_blk = _round_up(blk, max(_sublanes(x_dtype), _sublanes(out_dtype), _sublanes(pe_dtype)))
    return int(blk), int(per_row * pad_blk)


def _plan_3d(seq_len, batch, d_model, x_dtype, pe_dtype, out_dtype,
             vmem_budget=24 << 20, seq_block=None):
    isx, ispe, iso = (jnp.dtype(d).itemsize for d in (x_dtype, pe_dtype, out_dtype))
    lane = _round_up(d_model, 128)
    row_x = _round_up(batch, _sublanes(x_dtype)) * lane * isx
    row_o = _round_up(batch, _sublanes(out_dtype)) * lane * iso
    row_pe = _sublanes(pe_dtype) * lane * ispe           # size-1 dim pads to a sublane group
    per_row = 2 * (row_x + row_o + row_pe)
    if seq_block is None:
        blk = max(1, vmem_budget // per_row)
        blk = min(blk, 1024)
        blk = min(blk, -(-seq_len // 2))                 # >= 2 grid steps when possible (v7x)
    else:
        blk = int(seq_block)
    blk = max(1, min(blk, seq_len))
    return int(blk), int(per_row * blk)


# ----------------------------- forward ---------------------------------------

@partial(jax.jit, static_argnames=("seq_block", "force_pallas"))
def positional_encoding_forward(x: jnp.ndarray, pe: jnp.ndarray,
                                seq_block: int | None = None,
                                force_pallas: bool = False) -> jnp.ndarray:
    """x: (seq_len, batch, d_model); pe: (max_len, 1, d_model), max_len >= seq_len."""
    seq_len, batch, d_model = x.shape
    assert pe.ndim == 3 and pe.shape[1] == 1 and pe.shape[2] == d_model
    assert pe.shape[0] >= seq_len
    out_dtype = jnp.result_type(x.dtype, pe.dtype)       # torch promotion semantics

    # Fast path: for KB-scale inputs the fixed pallas_call overhead dominates;
    # XLA's fused add is strictly faster there.
    if not force_pallas and x.size * jnp.dtype(x.dtype).itemsize < (1 << 20):
        return (x + pe[:seq_len]).astype(out_dtype)

    use_2d = (batch % _sublanes(x.dtype) != 0) or (batch % _sublanes(out_dtype) != 0)

    if use_2d:
        # Dense 2-D slab: rows = seq, lanes = batch*d_model (free reshape of a
        # contiguous array). pe is broadcast over batch inside the kernel.
        blk, vmem_needed = _plan_2d(seq_len, batch, d_model,
                                    x.dtype, pe.dtype, out_dtype, seq_block=seq_block)
        grid = (pl.cdiv(seq_len, blk),)
        x2d = x.reshape(seq_len, batch * d_model)
        pe2d = pe.reshape(pe.shape[0], d_model)
        out2d = pl.pallas_call(
            partial(_pos_enc_kernel_2d, batch=batch),
            out_shape=jax.ShapeDtypeStruct((seq_len, batch * d_model), out_dtype),
            grid=grid,
            in_specs=[
                pl.BlockSpec((blk, batch * d_model), lambda i: (i, 0)),
                pl.BlockSpec((blk, d_model), lambda i: (i, 0)),
            ],
            out_specs=pl.BlockSpec((blk, batch * d_model), lambda i: (i, 0)),
            compiler_params=pltpu.CompilerParams(
                dimension_semantics=("parallel",),
                vmem_limit_bytes=max(32 << 20, int(vmem_needed * 1.25)),
            ),
        )(x2d, pe2d)
        return out2d.reshape(seq_len, batch, d_model)

    # batch is sublane-aligned: keep 3-D tiles, pe broadcasts over the batch dim.
    blk, vmem_needed = _plan_3d(seq_len, batch, d_model,
                                x.dtype, pe.dtype, out_dtype, seq_block=seq_block)
    grid = (pl.cdiv(seq_len, blk),)
    return pl.pallas_call(
        _pos_enc_kernel_3d,
        out_shape=jax.ShapeDtypeStruct((seq_len, batch, d_model), out_dtype),
        grid=grid,
        in_specs=[
            pl.BlockSpec((blk, batch, d_model), lambda i: (i, 0, 0)),
            pl.BlockSpec((blk, 1, d_model), lambda i: (i, 0, 0)),
        ],
        out_specs=pl.BlockSpec((blk, batch, d_model), lambda i: (i, 0, 0)),
        compiler_params=pltpu.CompilerParams(
            dimension_semantics=("parallel",),
            vmem_limit_bytes=max(32 << 20, int(vmem_needed * 1.25)),
        ),
    )(x, pe)


# ----------------------------- tests -----------------------------------------

if __name__ == "__main__":
    key = jax.random.PRNGKey(0)

    # 1) Small module-consistent shape (seq=8, batch=2, d_model=32), 2-D path,
    #    single full block; force the Pallas kernel (fast path would skip it).
    seq_len, batch, d_model = 8, 2, 32
    pe = _build_pe(d_model, max_len=64)
    x = jax.random.normal(key, (seq_len, batch, d_model), dtype=jnp.float32)
    out = jax.block_until_ready(positional_encoding_forward(x, pe, force_pallas=True))
    ref = x + pe[:seq_len]
    assert out.shape == x.shape and out.dtype == ref.dtype
    assert jnp.allclose(out, ref, atol=1e-6, rtol=1e-6), "mismatch (2D path, 1 block)"

    # 1b) Fast (non-Pallas) path gives the same answer.
    out_fast = jax.block_until_ready(positional_encoding_forward(x, pe))
    assert jnp.allclose(out_fast, ref, atol=1e-6, rtol=1e-6), "mismatch (fast path)"

    # 2) Small batch, multi-step grid (2-D path, 2 seq tiles).
    x2 = jax.random.normal(jax.random.PRNGKey(1), (256, 4, 128), dtype=jnp.float32)
    pe2 = _build_pe(128, max_len=512)
    out2 = jax.block_until_ready(positional_encoding_forward(x2, pe2, force_pallas=True))
    ref2 = x2 + pe2[:256]
    assert jnp.allclose(out2, ref2, atol=1e-6, rtol=1e-6), "mismatch (2D path, gridded)"

    # 3) Sublane-aligned batch -> 3-D path, 2 seq tiles.
    x3 = jax.random.normal(jax.random.PRNGKey(2), (64, 8, 128), dtype=jnp.float32)
    pe3 = _build_pe(128, max_len=128)
    out3 = jax.block_until_ready(positional_encoding_forward(x3, pe3, force_pallas=True))
    ref3 = x3 + pe3[:64]
    assert jnp.allclose(out3, ref3, atol=1e-6, rtol=1e-6), "mismatch (3D path)"

    print("KERNEL_OK")
</pallas_src>

<mosaic_0001>
module attributes {stable_mosaic.version = 11 : i64} {
  func.func @_pos_enc_kernel_2d(%arg0: i32, %arg1: memref<8x64xf32, #tpu.memory_space<vmem>>, %arg2: memref<8x32xf32, #tpu.memory_space<vmem>>, %arg3: memref<8x64xf32, #tpu.memory_space<vmem>>) attributes {dimension_semantics = [#tpu.dimension_semantics<parallel>], iteration_bounds = array<i64: 1>, scalar_prefetch = 0 : i64, scratch_operands = 0 : i64, tpu.core_type = #tpu.core_type<tc>, window_params = [{transform_indices = @transform_0, window_bounds = array<i64: 8, 64>}, {transform_indices = @transform_1, window_bounds = array<i64: 8, 32>}, {transform_indices = @transform_2, window_bounds = array<i64: 8, 64>}]} {
    %c0 = arith.constant 0 : index
    %c0_0 = arith.constant 0 : index
    %0 = vector.load %arg2[%c0, %c0_0] : memref<8x32xf32, #tpu.memory_space<vmem>>, vector<8x32xf32>
    %1 = tpu.concatenate %0, %0 in 1 : vector<8x32xf32>, vector<8x32xf32> -> vector<8x64xf32>
    %c0_1 = arith.constant 0 : index
    %c0_2 = arith.constant 0 : index
    %2 = vector.load %arg1[%c0_1, %c0_2] : memref<8x64xf32, #tpu.memory_space<vmem>>, vector<8x64xf32>
    %3 = arith.addf %2, %1 : vector<8x64xf32>
    %c0_3 = arith.constant 0 : index
    %c0_4 = arith.constant 0 : index
    %4 = vector.load %arg3[%c0_3, %c0_4] : memref<8x64xf32, #tpu.memory_space<vmem>>, vector<8x64xf32>
    tpu.vector_store %arg3[%c0_3, %c0_4], %3 {strides = array<i32>} : memref<8x64xf32, #tpu.memory_space<vmem>>, vector<8x64xf32>,
    return
  }
  func.func @transform_0(%arg0: i32) -> (i32, i32) {
    %c0_i32 = arith.constant 0 : i32
    %c0_i32_0 = arith.constant 0 : i32
    return %arg0, %c0_i32 : i32, i32
  }
  func.func @transform_1(%arg0: i32) -> (i32, i32) {
    %c0_i32 = arith.constant 0 : i32
    %c0_i32_0 = arith.constant 0 : i32
    return %arg0, %c0_i32 : i32, i32
  }
  func.func @transform_2(%arg0: i32) -> (i32, i32) {
    %c0_i32 = arith.constant 0 : i32
    %c0_i32_0 = arith.constant 0 : i32
    return %arg0, %c0_i32 : i32, i32
  }
}

</mosaic_0001>

<bundles_post_ra>
// kernel: positional_encoding_forward.1
= control target key start
LH: loop header
LB: loop body
LE: loop exit
PB: predicated region body
PF: predicated region fallthrough
CT: control target
= control target key end

     0   :  { %s27_s11 = smov 32   ;;  %vm16_vm0 = vcmask 261120   ;;  %vm20_vm1 = vcmask 523264   ;;  %s52_s1 = inlined_call_operand.vmem [shape: f32[64,32], index: 1, kind: input, shape index: {}]   ;;  %s53_s0 = inlined_call_operand.vmem [shape: f32[8,64], index: 0, kind: input, shape index: {}]   ;;  %s54_s2 = inlined_call_operand.vmem [shape: f32[8,64], index: 2, kind: output, shape index: {}]  }
   0x1   :  { %v11_v0 = vld [vmem:[%s52_s1] sm:$0xff] }
   0x2   :  { %13 = vrot.lane.b32.xlu0 %v11_v0, %s27_s11  ;;  %v18_v1 = vld [vmem:[%s53_s0] sm:$0xff] }
  0x74   :  { %v14_v2 = vpop.permute.xlu0 %13 }
  0x75   :  { %v17_v3 = vsel %vm16_vm0, %v11_v0, %v14_v2 }
  0x76   :  { %v19_v4 = vadd.f32 %v18_v1, %v17_v3 }
  0x78   :  { %21 = vst.msk [vmem:[%s54_s2] sm:$0xff] %vm20_vm1, %v19_v4 }

</bundles_post_ra>
